<compile_context>
chip_gen: v7x
topology: tpu7x:2x2x1
jax: 0.10.0
libtpu: 0.0.40
codegen_flags: <defaults>
</compile_context>

<pallas_src>
import functools

import jax
import jax.numpy as jnp
from jax import lax
from jax.experimental import pallas as pl
from jax.experimental.pallas import tpu as pltpu

_COS_EPS = 1e-8  # nn.CosineSimilarity default eps


def _round_up(x, m):
    return ((x + m - 1) // m) * m


def _kl_loss_kernel(zxs_ref, zxt_ref, zys_ref, zyt_ref, out_s_ref, out_t_ref, *,
                    temperature, n_valid_rows, block_rows, mask_rows, use_bf16,
                    approx_recip):
    inv_t = jnp.float32(1.0 / temperature)

    def normalize_rows(x):
        x = x.astype(jnp.float32)
        sq = jnp.sum(x * x, axis=-1, keepdims=True)
        # 1 / max(||x||, eps) == rsqrt(max(||x||^2, eps^2))  (EUP rsqrt + VPU mul)
        return x * lax.rsqrt(jnp.maximum(sq, jnp.float32(_COS_EPS * _COS_EPS)))

    mxu_dtype = jnp.bfloat16 if use_bf16 else jnp.float32
    zxs_n = normalize_rows(zxs_ref[...]).astype(mxu_dtype)
    zxt_n = normalize_rows(zxt_ref[...]).astype(mxu_dtype)
    zys_n = zys_ref[...]  # pre-normalized (and optionally pre-cast) in wrapper
    zyt_n = zyt_ref[...]

    # NT matmul: contract the feature (last) dims directly; no explicit .T copy.
    dn = (((1,), (1,)), ((), ()))
    sim_s = lax.dot_general(zxs_n, zys_n, dimension_numbers=dn,
                            preferred_element_type=jnp.float32) * inv_t
    sim_t = lax.dot_general(zxt_n, zyt_n, dimension_numbers=dn,
                            preferred_element_type=jnp.float32) * inv_t

    def softmax_parts(sim):
        m = jnp.max(sim, axis=-1, keepdims=True)
        z = sim - m
        e = jnp.exp(z)
        l = jnp.sum(e, axis=-1, keepdims=True)
        return z, e, l

    z_s, e_s, l_s = softmax_parts(sim_s)
    z_t, e_t, l_t = softmax_parts(sim_t)

    # d = log_ps - log_pt = (z_s - z_t) - (log l_s - log l_t)   (per-row logs only)
    d = (z_s - z_t) - (jnp.log(l_s) - jnp.log(l_t))

    # sum_j p*d = recip(l) * sum_j e*d   (no materialized softmax probabilities)
    row_s = jnp.sum(e_s * d, axis=-1, keepdims=True) * pl.reciprocal(
        l_s, approx=approx_recip)
    row_t = jnp.sum(e_t * d, axis=-1, keepdims=True) * pl.reciprocal(
        l_t, approx=approx_recip)

    if mask_rows:  # zero out contributions from zero-padded rows (static branch)
        row0 = pl.program_id(0) * block_rows
        row_ids = row0 + lax.broadcasted_iota(jnp.int32, (block_rows, 1), 0)
        valid = (row_ids < n_valid_rows).astype(jnp.float32)
        row_s = row_s * valid
        row_t = row_t * valid

    # loss_s = mean p_t*(log_pt - log_ps) = -sum(p_t*d)/(N*M)
    # loss_t = mean p_s*(log_ps - log_pt) =  sum(p_s*d)/(N*M)   (divide in wrapper)
    out_s_ref[0, 0] = -jnp.sum(row_t)
    out_t_ref[0, 0] = jnp.sum(row_s)


def kl_loss(zxs, zys, zxt, zyt, temperature=0.1, *, block_rows=128,
            use_bf16_matmul=False):
    """Pallas implementation of KLLoss.forward. Returns (loss_s, loss_t) scalars.

    block_rows: row-tile size (default 128 keeps the live (tm, N) f32
    intermediates within v7x's smaller VMEM budget; 256-512 is fine on v5e/v6e).
    use_bf16_matmul: bf16 MXU operands + approx reciprocal fast path (v6e/v7x).
    """
    n_rows, d = zxs.shape
    n_cols = zys.shape[0]
    assert zxt.shape == (n_rows, d) and zyt.shape == (n_cols, d)

    # Lane-dense feature dim (zero padding is inert for dots and norms).
    d_pad = max(_round_up(d, 128), 128)

    def pad_feat(x):
        x = x.astype(jnp.float32)
        if d_pad != d:
            x = jnp.pad(x, ((0, 0), (0, d_pad - d)))
        return x

    # Hoist the y-side normalization out of the kernel (done once, not per tile).
    def normalize(x):
        nrm = jnp.sqrt(jnp.sum(x * x, axis=-1, keepdims=True))
        return x / jnp.maximum(nrm, _COS_EPS)

    y_dtype = jnp.bfloat16 if use_bf16_matmul else jnp.float32
    zys_n = pad_feat(normalize(zys.astype(jnp.float32))).astype(y_dtype)
    zyt_n = pad_feat(normalize(zyt.astype(jnp.float32))).astype(y_dtype)

    # Row tiling of the x side (sublane-aligned tile, pad + mask the remainder).
    tm = min(_round_up(block_rows, 8), _round_up(n_rows, 8))
    n_rows_pad = _round_up(n_rows, tm)
    grid = (n_rows_pad // tm,)

    def pad_rows(x):
        if n_rows_pad != n_rows:
            x = jnp.pad(x, ((0, n_rows_pad - n_rows), (0, 0)))
        return x

    zxs_p = pad_rows(pad_feat(zxs))
    zxt_p = pad_rows(pad_feat(zxt))

    kernel = functools.partial(
        _kl_loss_kernel,
        temperature=float(temperature),
        n_valid_rows=n_rows,
        block_rows=tm,
        mask_rows=(n_rows_pad != n_rows),
        use_bf16=use_bf16_matmul,
        approx_recip=use_bf16_matmul,
    )

    x_spec = pl.BlockSpec((tm, d_pad), lambda i: (i, 0))
    y_spec = pl.BlockSpec((n_cols, d_pad), lambda i: (0, 0))       # resident
    out_spec = pl.BlockSpec((1, 1), lambda i: (i, 0),
                            memory_space=pltpu.MemorySpace.SMEM)

    y_bytes = 2 if use_bf16_matmul else 4
    vmem_estimate = int(
        2 * n_cols * d_pad * y_bytes      # resident normalized y matrices
        + 2 * 2 * tm * d_pad * 4          # double-buffered x tiles (f32)
        + 10 * tm * n_cols * 4            # sim / exp / d intermediates
        + (2 << 20))                      # headroom
    vmem_limit = min(max(vmem_estimate, 32 * 1024 * 1024), 64 * 1024 * 1024)

    cost = pl.CostEstimate(
        flops=int(4 * n_rows * n_cols * d_pad + 10 * n_rows * n_cols),
        transcendentals=int(2 * n_rows * n_cols + 6 * n_rows + 2 * n_cols),
        bytes_accessed=int((2 * n_rows_pad + 2 * n_cols) * d_pad * 4 + 8 * grid[0]),
    )

    part_s, part_t = pl.pallas_call(
        kernel,
        grid=grid,
        in_specs=[x_spec, x_spec, y_spec, y_spec],
        out_specs=(out_spec, out_spec),
        out_shape=(jax.ShapeDtypeStruct((grid[0], 1), jnp.float32),
                   jax.ShapeDtypeStruct((grid[0], 1), jnp.float32)),
        compiler_params=pltpu.CompilerParams(
            dimension_semantics=("parallel",),
            vmem_limit_bytes=vmem_limit),
        cost_estimate=cost,
    )(zxs_p, zxt_p, zys_n, zyt_n)

    scale = jnp.float32(1.0 / (n_rows * n_cols))
    return jnp.sum(part_s) * scale, jnp.sum(part_t) * scale


def _reference(zxs, zys, zxt, zyt, temperature=0.1):
    """Pure-JAX reference mirroring the PyTorch forward."""
    def cos_mat(zx, zy):
        nx = jnp.maximum(jnp.linalg.norm(zx, axis=-1, keepdims=True), _COS_EPS)
        ny = jnp.maximum(jnp.linalg.norm(zy, axis=-1, keepdims=True), _COS_EPS)
        return (zx / nx) @ (zy / ny).T

    p_s = jax.nn.softmax(cos_mat(zxs, zys) / temperature, axis=1)
    p_t = jax.nn.softmax(cos_mat(zxt, zyt) / temperature, axis=1)
    loss_s = jnp.mean(p_t * (jnp.log(p_t) - jnp.log(p_s)))
    loss_t = jnp.mean(p_s * (jnp.log(p_s) - jnp.log(p_t)))
    return loss_s, loss_t


if __name__ == "__main__":
    key = jax.random.PRNGKey(0)
    k1, k2, k3, k4 = jax.random.split(key, 4)
    N, D = 8, 32  # small batch of embeddings
    zxs = jax.random.normal(k1, (N, D), dtype=jnp.float32)
    zys = jax.random.normal(k2, (N, D), dtype=jnp.float32)
    zxt = jax.random.normal(k3, (N, D), dtype=jnp.float32)
    zyt = jax.random.normal(k4, (N, D), dtype=jnp.float32)

    loss_s, loss_t = kl_loss(zxs, zys, zxt, zyt, temperature=0.1)
    jax.block_until_ready((loss_s, loss_t))
    ref_s, ref_t = _reference(zxs, zys, zxt, zyt, temperature=0.1)
    assert jnp.allclose(loss_s, ref_s, atol=1e-5, rtol=1e-5), (loss_s, ref_s)
    assert jnp.allclose(loss_t, ref_t, atol=1e-5, rtol=1e-5), (loss_t, ref_t)

    # Multi-step grid with row masking (N not a multiple of the tile, D not 128).
    N2, D2 = 40, 48
    kk = jax.random.split(jax.random.PRNGKey(1), 4)
    a, b, c, e = (jax.random.normal(k, (N2, D2), dtype=jnp.float32) for k in kk)
    ls2, lt2 = kl_loss(a, b, c, e, temperature=0.1, block_rows=16)
    jax.block_until_ready((ls2, lt2))
    rs2, rt2 = _reference(a, b, c, e, temperature=0.1)
    assert jnp.allclose(ls2, rs2, atol=1e-5, rtol=1e-5), (ls2, rs2)
    assert jnp.allclose(lt2, rt2, atol=1e-5, rtol=1e-5), (lt2, rt2)

    # bf16 MXU + approx-reciprocal fast path (looser tolerance by construction).
    ls3, lt3 = kl_loss(a, b, c, e, temperature=0.1, block_rows=16,
                       use_bf16_matmul=True)
    jax.block_until_ready((ls3, lt3))
    assert jnp.allclose(ls3, rs2, atol=3e-2, rtol=3e-2), (ls3, rs2)
    assert jnp.allclose(lt3, rt2, atol=3e-2, rtol=3e-2), (lt3, rt2)

    print("KERNEL_OK")
</pallas_src>

<mosaic_0001>
module attributes {stable_mosaic.version = 11 : i64} {
  func.func @_kl_loss_kernel(%arg0: i32, %arg1: memref<8x128xf32, #tpu.memory_space<vmem>>, %arg2: memref<8x128xf32, #tpu.memory_space<vmem>>, %arg3: memref<8x128xf32, #tpu.memory_space<vmem>>, %arg4: memref<8x128xf32, #tpu.memory_space<vmem>>, %arg5: memref<1x1xf32, #tpu.memory_space<smem>>, %arg6: memref<1x1xf32, #tpu.memory_space<smem>>) attributes {dimension_semantics = [#tpu.dimension_semantics<parallel>], iteration_bounds = array<i64: 1>, scalar_prefetch = 0 : i64, scratch_operands = 0 : i64, tpu.core_type = #tpu.core_type<tc>, window_params = [{transform_indices = @transform_0, window_bounds = array<i64: 8, 128>}, {transform_indices = @transform_1, window_bounds = array<i64: 8, 128>}, {pipeline_mode = #tpu.pipeline_mode<synchronous>, transform_indices = @transform_2, window_bounds = array<i64: 8, 128>}, {pipeline_mode = #tpu.pipeline_mode<synchronous>, transform_indices = @transform_3, window_bounds = array<i64: 8, 128>}, {transform_indices = @transform_4, window_bounds = array<i64: 1, 1>}, {transform_indices = @transform_5, window_bounds = array<i64: 1, 1>}]} {
    %c0 = arith.constant 0 : index
    %c0_0 = arith.constant 0 : index
    %0 = vector.load %arg1[%c0, %c0_0] : memref<8x128xf32, #tpu.memory_space<vmem>>, vector<8x128xf32>
    %1 = arith.mulf %0, %0 : vector<8x128xf32>
    %cst = arith.constant dense<0.000000e+00> : vector<8xf32>
    %2 = vector.multi_reduction <add>, %1, %cst [1] : vector<8x128xf32> to vector<8xf32>
    %3 = vector.shape_cast %2 : vector<8xf32> to vector<8x1xf32>
    %cst_1 = arith.constant 1.000000e-16 : f32
    %4 = vector.broadcast %cst_1 : f32 to vector<8x1xf32>
    %5 = arith.maximumf %3, %4 : vector<8x1xf32>
    %6 = math.rsqrt %5 : vector<8x1xf32>
    %7 = vector.broadcast %6 : vector<8x1xf32> to vector<8x128xf32>
    %8 = arith.mulf %0, %7 : vector<8x128xf32>
    %c0_2 = arith.constant 0 : index
    %c0_3 = arith.constant 0 : index
    %9 = vector.load %arg2[%c0_2, %c0_3] : memref<8x128xf32, #tpu.memory_space<vmem>>, vector<8x128xf32>
    %10 = arith.mulf %9, %9 : vector<8x128xf32>
    %cst_4 = arith.constant dense<0.000000e+00> : vector<8xf32>
    %11 = vector.multi_reduction <add>, %10, %cst_4 [1] : vector<8x128xf32> to vector<8xf32>
    %12 = vector.shape_cast %11 : vector<8xf32> to vector<8x1xf32>
    %cst_5 = arith.constant 1.000000e-16 : f32
    %13 = vector.broadcast %cst_5 : f32 to vector<8x1xf32>
    %14 = arith.maximumf %12, %13 : vector<8x1xf32>
    %15 = math.rsqrt %14 : vector<8x1xf32>
    %16 = vector.broadcast %15 : vector<8x1xf32> to vector<8x128xf32>
    %17 = arith.mulf %9, %16 : vector<8x128xf32>
    %c0_6 = arith.constant 0 : index
    %c0_7 = arith.constant 0 : index
    %18 = vector.load %arg3[%c0_6, %c0_7] : memref<8x128xf32, #tpu.memory_space<vmem>>, vector<8x128xf32>
    %c0_8 = arith.constant 0 : index
    %c0_9 = arith.constant 0 : index
    %19 = vector.load %arg4[%c0_8, %c0_9] : memref<8x128xf32, #tpu.memory_space<vmem>>, vector<8x128xf32>
    %cst_10 = arith.constant dense<0.000000e+00> : vector<8x8xf32>
    %20 = tpu.matmul %8, %18, %cst_10 {dimension_numbers = #tpu.dot_dimension_numbers<[1], [1], [0], [0], [0, 0, 1, 0], [], []>} : vector<8x128xf32>, vector<8x128xf32>, vector<8x8xf32> -> vector<8x8xf32>
    %cst_11 = arith.constant 1.000000e+01 : f32
    %21 = vector.broadcast %cst_11 : f32 to vector<8x8xf32>
    %22 = arith.mulf %20, %21 : vector<8x8xf32>
    %cst_12 = arith.constant dense<0.000000e+00> : vector<8x8xf32>
    %23 = tpu.matmul %17, %19, %cst_12 {dimension_numbers = #tpu.dot_dimension_numbers<[1], [1], [0], [0], [0, 0, 1, 0], [], []>} : vector<8x128xf32>, vector<8x128xf32>, vector<8x8xf32> -> vector<8x8xf32>
    %cst_13 = arith.constant 1.000000e+01 : f32
    %24 = vector.broadcast %cst_13 : f32 to vector<8x8xf32>
    %25 = arith.mulf %23, %24 : vector<8x8xf32>
    %cst_14 = arith.constant dense<0xFF800000> : vector<8xf32>
    %26 = vector.multi_reduction <maximumf>, %22, %cst_14 [1] : vector<8x8xf32> to vector<8xf32>
    %27 = vector.shape_cast %26 : vector<8xf32> to vector<8x1xf32>
    %28 = vector.broadcast %27 : vector<8x1xf32> to vector<8x8xf32>
    %29 = arith.subf %22, %28 : vector<8x8xf32>
    %30 = math.exp %29 : vector<8x8xf32>
    %cst_15 = arith.constant dense<0.000000e+00> : vector<8xf32>
    %31 = vector.multi_reduction <add>, %30, %cst_15 [1] : vector<8x8xf32> to vector<8xf32>
    %32 = vector.shape_cast %31 : vector<8xf32> to vector<8x1xf32>
    %cst_16 = arith.constant dense<0xFF800000> : vector<8xf32>
    %33 = vector.multi_reduction <maximumf>, %25, %cst_16 [1] : vector<8x8xf32> to vector<8xf32>
    %34 = vector.shape_cast %33 : vector<8xf32> to vector<8x1xf32>
    %35 = vector.broadcast %34 : vector<8x1xf32> to vector<8x8xf32>
    %36 = arith.subf %25, %35 : vector<8x8xf32>
    %37 = math.exp %36 : vector<8x8xf32>
    %cst_17 = arith.constant dense<0.000000e+00> : vector<8xf32>
    %38 = vector.multi_reduction <add>, %37, %cst_17 [1] : vector<8x8xf32> to vector<8xf32>
    %39 = vector.shape_cast %38 : vector<8xf32> to vector<8x1xf32>
    %40 = arith.subf %29, %36 : vector<8x8xf32>
    %41 = math.log %32 : vector<8x1xf32>
    %42 = math.log %39 : vector<8x1xf32>
    %43 = arith.subf %41, %42 : vector<8x1xf32>
    %44 = vector.broadcast %43 : vector<8x1xf32> to vector<8x8xf32>
    %45 = arith.subf %40, %44 : vector<8x8xf32>
    %46 = arith.mulf %30, %45 : vector<8x8xf32>
    %cst_18 = arith.constant dense<0.000000e+00> : vector<8xf32>
    %47 = vector.multi_reduction <add>, %46, %cst_18 [1] : vector<8x8xf32> to vector<8xf32>
    %48 = vector.shape_cast %47 : vector<8xf32> to vector<8x1xf32>
    %49 = tpu.reciprocal %32 : vector<8x1xf32> -> vector<8x1xf32>
    %50 = arith.mulf %48, %49 : vector<8x1xf32>
    %51 = arith.mulf %37, %45 : vector<8x8xf32>
    %cst_19 = arith.constant dense<0.000000e+00> : vector<8xf32>
    %52 = vector.multi_reduction <add>, %51, %cst_19 [1] : vector<8x8xf32> to vector<8xf32>
    %53 = vector.shape_cast %52 : vector<8xf32> to vector<8x1xf32>
    %54 = tpu.reciprocal %39 : vector<8x1xf32> -> vector<8x1xf32>
    %55 = arith.mulf %53, %54 : vector<8x1xf32>
    %56 = vector.shape_cast %55 : vector<8x1xf32> to vector<1x8x1xf32>
    %cst_20 = arith.constant dense<0.000000e+00> : vector<1xf32>
    %57 = vector.multi_reduction <add>, %56, %cst_20 [1, 2] : vector<1x8x1xf32> to vector<1xf32>
    %58 = vector.shape_cast %57 : vector<1xf32> to vector<1x1x1xf32>
    %59 = vector.extract %58[0, 0, 0] : f32 from vector<1x1x1xf32>
    %cst_21 = arith.constant 0.000000e+00 : f32
    %60 = arith.subf %cst_21, %59 : f32
    %c0_22 = arith.constant 0 : index
    %c0_23 = arith.constant 0 : index
    %61 = memref.load %arg5[%c0_22, %c0_23] : memref<1x1xf32, #tpu.memory_space<smem>>
    memref.store %60, %arg5[%c0_22, %c0_23] : memref<1x1xf32, #tpu.memory_space<smem>>
    %62 = vector.shape_cast %50 : vector<8x1xf32> to vector<1x8x1xf32>
    %cst_24 = arith.constant dense<0.000000e+00> : vector<1xf32>
    %63 = vector.multi_reduction <add>, %62, %cst_24 [1, 2] : vector<1x8x1xf32> to vector<1xf32>
    %64 = vector.shape_cast %63 : vector<1xf32> to vector<1x1x1xf32>
    %65 = vector.extract %64[0, 0, 0] : f32 from vector<1x1x1xf32>
    %c0_25 = arith.constant 0 : index
    %c0_26 = arith.constant 0 : index
    %66 = memref.load %arg6[%c0_25, %c0_26] : memref<1x1xf32, #tpu.memory_space<smem>>
    memref.store %65, %arg6[%c0_25, %c0_26] : memref<1x1xf32, #tpu.memory_space<smem>>
    return
  }
  func.func @transform_0(%arg0: i32) -> (i32, i32) {
    %c0_i32 = arith.constant 0 : i32
    %c0_i32_0 = arith.constant 0 : i32
    return %arg0, %c0_i32 : i32, i32
  }
  func.func @transform_1(%arg0: i32) -> (i32, i32) {
    %c0_i32 = arith.constant 0 : i32
    %c0_i32_0 = arith.constant 0 : i32
    return %arg0, %c0_i32 : i32, i32
  }
  func.func @transform_2(%arg0: i32) -> (i32, i32) {
    %c0_i32 = arith.constant 0 : i32
    %c0_i32_0 = arith.constant 0 : i32
    %c0_i32_1 = arith.constant 0 : i32
    return %c0_i32, %c0_i32_0 : i32, i32
  }
  func.func @transform_3(%arg0: i32) -> (i32, i32) {
    %c0_i32 = arith.constant 0 : i32
    %c0_i32_0 = arith.constant 0 : i32
    %c0_i32_1 = arith.constant 0 : i32
    return %c0_i32, %c0_i32_0 : i32, i32
  }
  func.func @transform_4(%arg0: i32) -> (i32, i32) {
    %c0_i32 = arith.constant 0 : i32
    %c0_i32_0 = arith.constant 0 : i32
    return %arg0, %c0_i32 : i32, i32
  }
  func.func @transform_5(%arg0: i32) -> (i32, i32) {
    %c0_i32 = arith.constant 0 : i32
    %c0_i32_0 = arith.constant 0 : i32
    return %arg0, %c0_i32 : i32, i32
  }
}

</mosaic_0001>

<bundles_post_ra>
// kernel: tpu_custom_call.1
= control target key start
LH: loop header
LB: loop body
LE: loop exit
PB: predicated region body
PF: predicated region fallthrough
CT: control target
= control target key end

     0   :  { %11 = vsyncpa [#allocation3], 0  ;;  %s546_s0 = inlined_call_operand.hbm [shape: f32[8,128], index: 0, kind: input, shape index: {}]   ;;  %s547_s1 = inlined_call_operand.hbm [shape: f32[8,128], index: 1, kind: input, shape index: {}]   ;;  %s548_s2 = inlined_call_operand.hbm [shape: f32[8,128], index: 2, kind: input, shape index: {}]   ;;  %s549_s3 = inlined_call_operand.vmem [shape: f32[8,128], index: 3, kind: input, shape index: {}]   ;;  %s550_s4 = inlined_call_operand.hbm [shape: f32[1,1], index: 4, kind: output, shape index: {0}]   ;;  %s551_s5 = inlined_call_operand.hbm [shape: f32[1,1], index: 5, kind: output, shape index: {1}]  }
   0x1   :  { %12 = vsyncpa [#allocation6], 0 }
   0x2   :  { %13 = vsyncpa [#allocation4], 0 }
   0x3   :  { %14 = vsyncpa [#allocation10], 0  ;;  %s440_s18 = smov [#allocation5]   ;;  %s441_s20 = smov [#allocation2]  }
   0x4   :  { %s31_s19 = sshll.u32 %s440_s18, 4  ;;  %s21_s21 = sshll.u32 %s441_s20, 4  ;;  %s32_s19 = int_to_ptr.vmem [resolvable:$true] %s31_s19  ;;  %s22_s21 = int_to_ptr.vmem [resolvable:$true] %s21_s21 }
   0x5   :  { %s346_s24 = scalar_lea.hbm %s547_s1, 128 }
   0x6   :  { %p347_p0 = scmp.ne.s32.totalorder %s547_s1, %s346_s24  ;;  %p350_p1 = scmp.lt.u32.totalorder %s346_s24, %s547_s1 }
   0x8   :  { %p352_p2 = pnand %p350_p1, %p347_p0 }
   0xa   :  { %355 = shalt.err (!%p352_p2)
}
   0xb   :  { %s356_s29 = scalar_lea.vmem %s32_s19, 128  ;;  %p361_p4 = scmp.lt.s32.totalorder %s32_s19, %s32_s19 }
   0xc   :  { %p357_p3 = scmp.ne.s32.totalorder %s32_s19, %s356_s29  ;;  %p362_p5 = scmp.lt.s32.totalorder %s356_s29, %s356_s29 }
   0xe   :  { %p363_p6 = por %p362_p5, %p361_p4 }
  0x10   :  { %p364_p7 = pnand %p363_p6, %p357_p3 }
  0x12   :  { %367 = shalt.err (!%p364_p7)
}
  0x13   :  { %34 = dma.hbm_to_vmem [thread:$0]  %s547_s1, 128, %s32_s19, [#allocation6]  }
  0x14   :  { %s368_s9 = scalar_lea.hbm %s546_s0, 128 }
  0x15   :  { %p369_p8 = scmp.ne.s32.totalorder %s546_s0, %s368_s9  ;;  %p372_p9 = scmp.lt.u32.totalorder %s368_s9, %s546_s0 }
  0x17   :  { %p374_p10 = pnand %p372_p9, %p369_p8 }
  0x19   :  { %377 = shalt.err (!%p374_p10)
}
  0x1a   :  { %s378_s14 = scalar_lea.vmem %s22_s21, 128  ;;  %p383_p12 = scmp.lt.s32.totalorder %s22_s21, %s22_s21 }
  0x1b   :  { %p379_p11 = scmp.ne.s32.totalorder %s22_s21, %s378_s14  ;;  %p384_p13 = scmp.lt.s32.totalorder %s378_s14, %s378_s14 }
  0x1d   :  { %p385_p0 = por %p384_p13, %p383_p12 }
  0x1f   :  { %p386_p1 = pnand %p385_p0, %p379_p11 }
  0x21   :  { %389 = shalt.err (!%p386_p1)
}
  0x22   :  { %24 = dma.hbm_to_vmem [thread:$0]  %s546_s0, 128, %s22_s21, [#allocation3]  }
  0x23   :  { %s442_s16 = smov [#allocation7]   ;;  %s390_s20 = scalar_lea.hbm %s548_s2, 128 }
  0x24   :  { %s41_s17 = sshll.u32 %s442_s16, 4  ;;  %p391_p2 = scmp.ne.s32.totalorder %s548_s2, %s390_s20  ;;  %s42_s17 = int_to_ptr.vmem [resolvable:$true] %s41_s17 }
  0x25   :  { %p394_p3 = scmp.lt.u32.totalorder %s390_s20, %s548_s2 }
  0x27   :  { %p396_p4 = pnand %p394_p3, %p391_p2 }
  0x29   :  { %399 = shalt.err (!%p396_p4)
}
  0x2a   :  { %s400_s26 = scalar_lea.vmem %s42_s17, 128  ;;  %p405_p6 = scmp.lt.s32.totalorder %s42_s17, %s42_s17 }
  0x2b   :  { %p401_p5 = scmp.ne.s32.totalorder %s42_s17, %s400_s26  ;;  %p406_p7 = scmp.lt.s32.totalorder %s400_s26, %s400_s26 }
  0x2d   :  { %p407_p8 = por %p406_p7, %p405_p6 }
  0x2f   :  { %p408_p9 = pnand %p407_p8, %p401_p5 }
  0x31   :  { %411 = shalt.err (!%p408_p9)
}
  0x32   :  { %44 = dma.hbm_to_vmem [thread:$0]  %s548_s2, 128, %s42_s17, [#allocation6]  }
  0x33   :  { %432 = dma.done.wait [#allocation3], 128  }
  0x34   :  { %433 = vsyncadd [#allocation3], 4294967168 }
  0x35   :  { %434 = dma.done.wait [#allocation6], 256  }
  0x36   :  { %435 = vsyncadd [#allocation6], 4294967040  ;;  %v56_v0 = vld [vmem:[#allocation2] sm:$0xff]  ;;  %v63_v1 = vld [vmem:[#allocation5] sm:$0xff]  ;;  %v443_v5 = vmov 0.0   ;;  %vm444_vm0 = vmmov 0  }
  0x37   :  { %v57_v2 = vmul.f32 %v56_v0, %v56_v0  ;;  %v64_v3 = vmul.f32 %v63_v1, %v63_v1  ;;  %v70_v4 = vld [vmem:[#allocation7] sm:$0xff]  ;;  %309 = vmatprep.subr.mxu0 %v443_v5  ;;  %311 = vmatprep.mubr.msk.f32.mxu0 %vm444_vm0, %v443_v5  ;;  %v71_v6 = vld [vmem:[%s549_s3] sm:$0xff]  ;;  %vm214_vm1 = vcmask 64512   ;;  %vm252_vm2 = vcmask 7168   ;;  %s412_s7 = scalar_lea.hbm %s550_s4, 16 }
  0x38   :  { %310 = vmatpush3.xpose.msra.mxu0 %v70_v4  ;;  %314 = vmatprep.subr.mxu1 %v443_v5  ;;  %p413_p10 = scmp.ne.s32.totalorder %s550_s4, %s412_s7  ;;  %p416_p11 = scmp.lt.u32.totalorder %s412_s7, %s550_s4 }
  0x39   :  { %58 = vadd.xlane.f32.xlu0 %v57_v2  ;;  %316 = vmatprep.mubr.msk.f32.mxu1 %vm444_vm0, %v443_v5 }
  0x3a   :  { %315 = vmatpush3.xpose.msra.mxu1 %v71_v6  ;;  %p418_p12 = pnand %p416_p11, %p413_p10 }
  0x3d   :  { %65 = vadd.xlane.f32.xlu0 %v64_v3 }
  0xc6   :  { %v59_v7 = vpop.xlane.xlu0 %58 }
  0xc7   :  { %v60_v8 = vmax.f32 %v59_v7, 1e-16 }
  0xc9   :  { %330 = vrsqrt.f32 %v60_v8 }
  0xca   :  { %v66_v9 = vpop.xlane.xlu0 %65 }
  0xcb   :  { %v67_v10 = vmax.f32 %v66_v9, 1e-16 }
  0xcd   :  { %332 = vrsqrt.f32 %v67_v10 }
  0xd3   :  { %v331_v11 = vpop.eup %330 }
  0xd4   :  { %v62_v12 = vmul.f32 %v331_v11, %v56_v0 }
  0xd6   :  { %312 = vmatmul.mubr.f32.vlgmr.msra.gmra.mrb[0].mxu0 %v62_v12 }
  0xd7   :  { %v333_v13 = vpop.eup %332 }
  0xd8   :  { %v69_v14 = vmul.f32 %v333_v13, %v63_v1 }
  0xda   :  { %317 = vmatmul.mubr.f32.vlgmr.msra.gmra.mrb[0].mxu1 %v69_v14 }
 0x1a9   :  { %v138_v15 = vpop.f32.mrb[0].mxu0 }
 0x1aa   :  { %v142_v16 = vmul.f32 10.0, %v138_v15  ;;  %v313_v17 = vpop.f32.mrb[1].mxu0 }
 0x1ac   :  { %v215_v18 = vsel %vm214_vm1, %v142_v16, -inf }
 0x1ad   :  { %216 = vmax.xlane.f32.xlu1 %v215_v18  ;;  %v209_v19 = vpop.f32.mrb[0].mxu1 }
 0x1ae   :  { %v213_v20 = vmul.f32 10.0, %v209_v19  ;;  %v318_v21 = vpop.f32.mrb[1].mxu1 }
 0x1b0   :  { %v224_v22 = vsel %vm214_vm1, %v213_v20, -inf }
 0x1b1   :  { %225 = vmax.xlane.f32.xlu1 %v224_v22 }
 0x23a   :  { %v217_v23 = vpop.xlane.xlu1 %216 }
 0x23b   :  { %v218_v24 = vsub.f32 %v142_v16, %v217_v23 }
 0x23d   :  { %v219_v25 = vmul.f32 1.442695, %v218_v24 }
 0x23e   :  { %v226_v26 = vpop.xlane.xlu1 %225 }
 0x23f   :  { %334 = vpow2.f32 %v219_v25  ;;  %v227_v27 = vsub.f32 %v213_v20, %v226_v26 }
 0x241   :  { %v228_v28 = vmul.f32 1.442695, %v227_v27  ;;  %v233_v29 = vsub.f32 %v218_v24, %v227_v27 }
 0x243   :  { %336 = vpow2.f32 %v228_v28 }
 0x249   :  { %v335_v30 = vpop.eup %334 }
 0x24a   :  { %v221_v31 = vsel %vm214_vm1, %v335_v30, 0.0 }
 0x24b   :  { %222 = vadd.xlane.f32.xlu0 %v221_v31 }
 0x24d   :  { %v337_v32 = vpop.eup %336 }
 0x24e   :  { %v230_v33 = vsel %vm214_vm1, %v337_v32, 0.0 }
 0x24f   :  { %231 = vadd.xlane.f32.xlu1 %v230_v33 }
 0x2d8   :  { %v223_v34 = vpop.xlane.xlu0 %222 }
 0x2d9   :  { %338 = vlog2.f32 %v223_v34 }
 0x2dc   :  { %v232_v35 = vpop.xlane.xlu1 %231 }
 0x2dd   :  { %340 = vlog2.f32 %v232_v35 }
 0x2de   :  { %342 = vrcp.f32 %v223_v34 }
 0x2df   :  { %344 = vrcp.f32 %v232_v35 }
 0x2e3   :  { %v339_v36 = vpop.eup %338 }
 0x2e4   :  { %v235_v38 = vmul.f32 0.6931472, %v339_v36 }
 0x2e7   :  { %v341_v37 = vpop.eup %340 }
 0x2e8   :  { %v237_v39 = vmul.f32 0.6931472, %v341_v37  ;;  %v343_v46 = vpop.eup %342 }
 0x2e9   :  { %v345_v47 = vpop.eup %344 }
 0x2ea   :  { %v238_v40 = vsub.f32 %v235_v38, %v237_v39 }
 0x2ec   :  { %v239_v41 = vsub.f32 %v233_v29, %v238_v40 }
 0x2ee   :  { %v246_v42 = vmul.f32 %v337_v32, %v239_v41  ;;  %v240_v43 = vmul.f32 %v335_v30, %v239_v41 }
 0x2f0   :  { %v247_v44 = vsel %vm214_vm1, %v246_v42, 0.0  ;;  %v241_v45 = vsel %vm214_vm1, %v240_v43, 0.0 }
 0x2f1   :  { %248 = vadd.xlane.f32.xlu0 %v247_v44  ;;  %242 = vadd.xlane.f32.xlu1 %v241_v45 }
 0x37e   :  { %v249_v48 = vpop.xlane.xlu0 %248  ;;  %v243_v49 = vpop.xlane.xlu1 %242 }
 0x37f   :  { %v251_v50 = vmul.f32 %v345_v47, %v249_v48  ;;  %v245_v51 = vmul.f32 %v343_v46, %v243_v49 }
 0x381   :  { %v253_v52 = vsel %vm252_vm2, %v251_v50, 0.0  ;;  %v266_v53 = vsel %vm252_vm2, %v245_v51, 0.0 }
 0x382   :  { %254 = vadd.xlane.f32.xlu0 %v253_v52  ;;  %267 = vadd.xlane.f32.xlu1 %v266_v53 }
 0x40f   :  { %v255_v54 = vpop.xlane.xlu0 %254  ;;  %v268_v55 = vpop.xlane.xlu1 %267 }
 0x410   :  { %v256_v56 = vrot.slane %v255_v54, 4  ;;  %v269_v57 = vrot.slane %v268_v55, 4 }
 0x412   :  { %v257_v58 = vadd.f32 %v256_v56, %v255_v54  ;;  %v270_v59 = vadd.f32 %v269_v57, %v268_v55 }
 0x414   :  { %v258_v60 = vrot.slane %v257_v58, 2  ;;  %v271_v61 = vrot.slane %v270_v59, 2 }
 0x416   :  { %v272_v62 = vadd.f32 %v271_v61, %v270_v59  ;;  %v259_v63 = vadd.f32 %v258_v60, %v257_v58 }
 0x418   :  { %v260_v0 = vrot.slane %v259_v63, 1  ;;  %v273_v1 = vrot.slane %v272_v62, 1 }
 0x41a   :  { %v261_v2 = vadd.f32 %v260_v0, %v259_v63  ;;  %v274_v3 = vadd.f32 %v273_v1, %v272_v62 }
 0x41c   :  { %319 = vpush %v261_v2 }
 0x41d   :  { %321 = vpush %v274_v3 }
 0x44d   :  { %s320_s3 = spop %319 }
 0x44e   :  { %s263_s28 = ssub.f32 0.0, %s320_s3  ;;  %s322_s29 = spop %321 }
 0x44f   :  { %277 = sst [smem:[#allocation9]] %s322_s29 }
 0x450   :  { %265 = sst [smem:[#allocation8]] %s263_s28 }
 0x451   :  { %421 = shalt.err (!%p418_p12)
}
 0x452   :  { %s445_s12 = smov [#allocation8]   ;;  %s422_s16 = scalar_lea.hbm %s551_s5, 16 }
 0x453   :  { %285 = dma.smem_to_hbm %s445_s12, 16, %s550_s4, [#allocation4]  }
 0x454   :  { %p423_p13 = scmp.ne.s32.totalorder %s551_s5, %s422_s16  ;;  %p426_p0 = scmp.lt.u32.totalorder %s422_s16, %s551_s5 }
 0x456   :  { %p428_p1 = pnand %p426_p0, %p423_p13 }
 0x458   :  { %431 = shalt.err (!%p428_p1)
}
 0x459   :  { %s446_s22 = smov [#allocation9]  }
 0x45a   :  { %293 = dma.smem_to_hbm %s446_s22, 16, %s551_s5, [#allocation10]  }
 0x45b   :  { %436 = dma.done.wait [#allocation4], 16  }
 0x45c   :  { %437 = vsyncadd [#allocation4], 4294967280 }
 0x45d   :  { %438 = dma.done.wait [#allocation10], 16  }
 0x45e   :  { %439 = vsyncadd [#allocation10], 4294967280 }
 0x45f   :  { %300 = sfence }
 0x460   :  { %301 = vsyncpa [#allocation3], 1 }
 0x461   :  { %302 = vsyncpa [#allocation6], 1 }
 0x462   :  { %303 = vsyncpa [#allocation4], 1 }
 0x463   :  { %304 = vsyncpa [#allocation10], 1 }

</bundles_post_ra>
